<compile_context>
chip_gen: v6e
topology: v6e:2x2x1
jax: 0.10.0
libtpu: 0.0.40
codegen_flags: <defaults>
</compile_context>

<pallas_src>
import jax
import jax.numpy as jnp
from jax.experimental import pallas as pl
from jax.experimental.pallas import tpu as pltpu

LANE = 128
SUBLANE = 8
MAX_BLOCK_ROWS = 2048   # (2048, 128) f32 tile = 1 MiB per input per pipeline buffer
SMOOTH = 1.0


def _iou_partial_kernel(x_ref, t_ref, out_i_ref, out_t_ref):
    """One grid step of the reduction.

    x_ref/t_ref:         (block_rows, LANE) tiles of logits / targets.
    out_i_ref/out_t_ref: (SUBLANE, LANE) vector accumulators for this partial
                         (resident across the reduction axis; written back once).
    """
    i = pl.program_id(1)

    @pl.when(i == 0)
    def _():
        out_i_ref[...] = jnp.zeros_like(out_i_ref)
        out_t_ref[...] = jnp.zeros_like(out_t_ref)

    x = x_ref[...].astype(jnp.float32)
    t = t_ref[...].astype(jnp.float32)

    # Single-EUP sigmoid: sigmoid(x) = 0.5 * (tanh(x/2) + 1).
    # tanh(-100) == -1.0 exactly, so -200 padding logits give p == 0.0 exactly.
    p = 0.5 * (jnp.tanh(0.5 * x) + 1.0)

    br = x.shape[0]
    pi = (p * t).reshape(br // SUBLANE, SUBLANE, LANE)
    pt = (p + t).reshape(br // SUBLANE, SUBLANE, LANE)

    # Sublane-group reduction = pure vreg adds (VALU); the expensive cross-lane
    # reduce happens once, in the wrapper, on the tiny outputs.
    out_i_ref[...] += jnp.sum(pi, axis=0)
    out_t_ref[...] += jnp.sum(pt, axis=0)


def _round_up(v, m):
    return ((v + m - 1) // m) * m


def _num_tensorcores():
    """Best-effort TensorCore count; falls back to 1 (safe: serial loop)."""
    try:
        info = pltpu.get_tpu_info()
        for attr in ("num_cores", "core_count", "num_tensorcores", "tensorcore_count"):
            v = getattr(info, attr, None)
            if isinstance(v, int) and v >= 1:
                return v
    except Exception:
        pass
    return 1


def iou_loss_pallas(inputs, targets, smooth=SMOOTH):
    """Scalar IoU loss matching IoULoss.forward (default smooth=1)."""
    x = inputs.reshape(-1)
    t = targets.reshape(-1)
    n = x.shape[0]

    # ---- static tiling decisions (Python ints) ----
    rows = pl.cdiv(n, LANE)
    n_splits = pl.cdiv(rows, MAX_BLOCK_ROWS)
    block_rows = _round_up(pl.cdiv(rows, n_splits), SUBLANE)
    num_blocks = pl.cdiv(rows, block_rows)

    cores = _num_tensorcores()
    if cores > 1 and num_blocks >= cores and num_blocks % cores == 0:
        num_partials = cores
    else:
        num_partials = 1
    bpp = num_blocks // num_partials

    rows_pad = num_blocks * block_rows
    n_pad = rows_pad * LANE

    # Tail-pad only when the flattened size is not tile-aligned (common image
    # shapes, incl. the test case, skip this entirely).  Padded logits of -200
    # give tanh(-100) == -1.0 exactly -> p == 0.0 exactly, padded targets are 0,
    # so padded elements contribute exactly zero to both sums.
    if n_pad != n:
        x = jnp.pad(x, (0, n_pad - n), constant_values=-200.0)
        t = jnp.pad(t, (0, n_pad - n), constant_values=0)

    x2 = x.reshape(rows_pad, LANE)
    t2 = t.reshape(rows_pad, LANE)

    if num_partials > 1 and hasattr(pltpu, "CORE_PARALLEL"):
        dim_sem = (pltpu.CORE_PARALLEL, pltpu.ARBITRARY)
    else:
        dim_sem = ("parallel", "arbitrary")

    out_i, out_t = pl.pallas_call(
        _iou_partial_kernel,
        out_shape=(
            jax.ShapeDtypeStruct((num_partials * SUBLANE, LANE), jnp.float32),
            jax.ShapeDtypeStruct((num_partials * SUBLANE, LANE), jnp.float32),
        ),
        grid_spec=pltpu.PrefetchScalarGridSpec(
            num_scalar_prefetch=0,
            grid=(num_partials, bpp),
            in_specs=[
                pl.BlockSpec((block_rows, LANE), lambda c, i: (c * bpp + i, 0)),
                pl.BlockSpec((block_rows, LANE), lambda c, i: (c * bpp + i, 0)),
            ],
            out_specs=[
                pl.BlockSpec((SUBLANE, LANE), lambda c, i: (c, 0)),
                pl.BlockSpec((SUBLANE, LANE), lambda c, i: (c, 0)),
            ],
        ),
        compiler_params=pltpu.CompilerParams(
            dimension_semantics=dim_sem,
            vmem_limit_bytes=32 * 1024 * 1024,
        ),
    )(x2, t2)

    intersection = jnp.sum(out_i)
    total = jnp.sum(out_t)
    union = total - intersection
    iou = (intersection + smooth) / (union + smooth)
    return 1.0 - iou


def iou_loss_ref(inputs, targets, smooth=SMOOTH):
    """Pure-JAX reference of the PyTorch forward pass."""
    p = jax.nn.sigmoid(inputs).reshape(-1).astype(jnp.float32)
    t = targets.reshape(-1).astype(jnp.float32)
    intersection = jnp.sum(p * t)
    total = jnp.sum(p + t)
    union = total - intersection
    return 1.0 - (intersection + smooth) / (union + smooth)


if __name__ == "__main__":
    key = jax.random.PRNGKey(0)
    k1, k2 = jax.random.split(key)

    # NCHW logits and binary targets, same as the PyTorch module would see.
    inputs = jax.random.normal(k1, (2, 4, 16, 16), dtype=jnp.float32)
    targets = (jax.random.uniform(k2, (2, 4, 16, 16)) > 0.5).astype(jnp.float32)

    loss = jax.block_until_ready(iou_loss_pallas(inputs, targets))
    ref = jax.block_until_ready(iou_loss_ref(inputs, targets))

    assert jnp.allclose(loss, ref, rtol=1e-5, atol=1e-6), (loss, ref)
    print("KERNEL_OK")
</pallas_src>

<mosaic_0001>
module attributes {stable_mosaic.version = 11 : i64} {
  func.func @_iou_partial_kernel(%arg0: i32, %arg1: i32, %arg2: memref<16x128xf32, #tpu.memory_space<vmem>>, %arg3: memref<16x128xf32, #tpu.memory_space<vmem>>, %arg4: memref<8x128xf32, #tpu.memory_space<vmem>>, %arg5: memref<8x128xf32, #tpu.memory_space<vmem>>) attributes {dimension_semantics = [#tpu.dimension_semantics<parallel>, #tpu.dimension_semantics<arbitrary>], iteration_bounds = array<i64: 1, 1>, scalar_prefetch = 0 : i64, scratch_operands = 0 : i64, tpu.core_type = #tpu.core_type<tc>, window_params = [{transform_indices = @transform_0, window_bounds = array<i64: 16, 128>}, {transform_indices = @transform_1, window_bounds = array<i64: 16, 128>}, {transform_indices = @transform_2, window_bounds = array<i64: 8, 128>}, {transform_indices = @transform_3, window_bounds = array<i64: 8, 128>}]} {
    %c0_i32 = arith.constant 0 : i32
    %0 = arith.cmpi eq, %arg1, %c0_i32 : i32
    %1 = arith.extui %0 : i1 to i32
    %c0_i32_0 = arith.constant 0 : i32
    %2 = arith.cmpi ne, %1, %c0_i32_0 : i32
    scf.if %2 {
      %cst_16 = arith.constant 0.000000e+00 : f32
      %24 = vector.broadcast %cst_16 : f32 to vector<8x128xf32>
      %c0_17 = arith.constant 0 : index
      %c0_18 = arith.constant 0 : index
      %25 = vector.load %arg4[%c0_17, %c0_18] : memref<8x128xf32, #tpu.memory_space<vmem>>, vector<8x128xf32>
      tpu.vector_store %arg4[%c0_17, %c0_18], %24 {strides = array<i32>} : memref<8x128xf32, #tpu.memory_space<vmem>>, vector<8x128xf32>,
      %cst_19 = arith.constant 0.000000e+00 : f32
      %26 = vector.broadcast %cst_19 : f32 to vector<8x128xf32>
      %c0_20 = arith.constant 0 : index
      %c0_21 = arith.constant 0 : index
      %27 = vector.load %arg5[%c0_20, %c0_21] : memref<8x128xf32, #tpu.memory_space<vmem>>, vector<8x128xf32>
      tpu.vector_store %arg5[%c0_20, %c0_21], %26 {strides = array<i32>} : memref<8x128xf32, #tpu.memory_space<vmem>>, vector<8x128xf32>,
    } else {
    }
    %c0 = arith.constant 0 : index
    %c0_1 = arith.constant 0 : index
    %3 = vector.load %arg2[%c0, %c0_1] : memref<16x128xf32, #tpu.memory_space<vmem>>, vector<16x128xf32>
    %c0_2 = arith.constant 0 : index
    %c0_3 = arith.constant 0 : index
    %4 = vector.load %arg3[%c0_2, %c0_3] : memref<16x128xf32, #tpu.memory_space<vmem>>, vector<16x128xf32>
    %cst = arith.constant 5.000000e-01 : f32
    %5 = vector.broadcast %cst : f32 to vector<16x128xf32>
    %6 = arith.mulf %5, %3 : vector<16x128xf32>
    %7 = math.tanh %6 : vector<16x128xf32>
    %cst_4 = arith.constant 1.000000e+00 : f32
    %8 = vector.broadcast %cst_4 : f32 to vector<16x128xf32>
    %9 = arith.addf %7, %8 : vector<16x128xf32>
    %cst_5 = arith.constant 5.000000e-01 : f32
    %10 = vector.broadcast %cst_5 : f32 to vector<16x128xf32>
    %11 = arith.mulf %10, %9 : vector<16x128xf32>
    %12 = arith.mulf %11, %4 : vector<16x128xf32>
    %13 = vector.shape_cast %12 : vector<16x128xf32> to vector<2x8x128xf32>
    %14 = arith.addf %11, %4 : vector<16x128xf32>
    %15 = vector.shape_cast %14 : vector<16x128xf32> to vector<2x8x128xf32>
    %c0_6 = arith.constant 0 : index
    %c0_7 = arith.constant 0 : index
    %16 = vector.load %arg4[%c0_6, %c0_7] : memref<8x128xf32, #tpu.memory_space<vmem>>, vector<8x128xf32>
    %cst_8 = arith.constant dense<0.000000e+00> : vector<8x128xf32>
    %17 = vector.multi_reduction <add>, %13, %cst_8 [0] : vector<2x8x128xf32> to vector<8x128xf32>
    %18 = arith.addf %16, %17 : vector<8x128xf32>
    %c0_9 = arith.constant 0 : index
    %c0_10 = arith.constant 0 : index
    %19 = vector.load %arg4[%c0_9, %c0_10] : memref<8x128xf32, #tpu.memory_space<vmem>>, vector<8x128xf32>
    tpu.vector_store %arg4[%c0_9, %c0_10], %18 {strides = array<i32>} : memref<8x128xf32, #tpu.memory_space<vmem>>, vector<8x128xf32>,
    %c0_11 = arith.constant 0 : index
    %c0_12 = arith.constant 0 : index
    %20 = vector.load %arg5[%c0_11, %c0_12] : memref<8x128xf32, #tpu.memory_space<vmem>>, vector<8x128xf32>
    %cst_13 = arith.constant dense<0.000000e+00> : vector<8x128xf32>
    %21 = vector.multi_reduction <add>, %15, %cst_13 [0] : vector<2x8x128xf32> to vector<8x128xf32>
    %22 = arith.addf %20, %21 : vector<8x128xf32>
    %c0_14 = arith.constant 0 : index
    %c0_15 = arith.constant 0 : index
    %23 = vector.load %arg5[%c0_14, %c0_15] : memref<8x128xf32, #tpu.memory_space<vmem>>, vector<8x128xf32>
    tpu.vector_store %arg5[%c0_14, %c0_15], %22 {strides = array<i32>} : memref<8x128xf32, #tpu.memory_space<vmem>>, vector<8x128xf32>,
    return
  }
  func.func @transform_0(%arg0: i32, %arg1: i32) -> (i32, i32) {
    %c1_i32 = arith.constant 1 : i32
    %0 = arith.muli %arg0, %c1_i32 : i32
    %1 = arith.addi %0, %arg1 : i32
    %c0_i32 = arith.constant 0 : i32
    %c0_i32_0 = arith.constant 0 : i32
    return %1, %c0_i32 : i32, i32
  }
  func.func @transform_1(%arg0: i32, %arg1: i32) -> (i32, i32) {
    %c1_i32 = arith.constant 1 : i32
    %0 = arith.muli %arg0, %c1_i32 : i32
    %1 = arith.addi %0, %arg1 : i32
    %c0_i32 = arith.constant 0 : i32
    %c0_i32_0 = arith.constant 0 : i32
    return %1, %c0_i32 : i32, i32
  }
  func.func @transform_2(%arg0: i32, %arg1: i32) -> (i32, i32) {
    %c0_i32 = arith.constant 0 : i32
    %c0_i32_0 = arith.constant 0 : i32
    return %arg0, %c0_i32 : i32, i32
  }
  func.func @transform_3(%arg0: i32, %arg1: i32) -> (i32, i32) {
    %c0_i32 = arith.constant 0 : i32
    %c0_i32_0 = arith.constant 0 : i32
    return %arg0, %c0_i32 : i32, i32
  }
}

</mosaic_0001>

<bundles_post_ra>
// kernel: tpu_custom_call.1
= control target key start
LH: loop header
LB: loop body
LE: loop exit
PB: predicated region body
PF: predicated region fallthrough
CT: control target
= control target key end

     0   :  { %9 = vsyncpa [#allocation3], 0  ;;  %s252_s0 = inlined_call_operand.hbm [shape: f32[16,128], index: 0, kind: input, shape index: {}]   ;;  %s253_s1 = inlined_call_operand.hbm [shape: f32[16,128], index: 1, kind: input, shape index: {}]   ;;  %s254_s2 = inlined_call_operand.hbm [shape: f32[8,128], index: 2, kind: output, shape index: {0}]   ;;  %s255_s3 = inlined_call_operand.hbm [shape: f32[8,128], index: 3, kind: output, shape index: {1}]  }
   0x1   :  { %10 = vsyncpa [#allocation6], 0 }
   0x2   :  { %11 = vsyncpa [#allocation4], 0 }
   0x3   :  { %12 = vsyncpa [#allocation9], 0  ;;  %s214_s12 = smov [#allocation2]  }
   0x4   :  { %s22_s13 = sshll.u32 %s214_s12, 4  ;;  %s23_s13 = int_to_ptr.vmem [resolvable:$true] %s22_s13 }
   0x5   :  { %s134_s14 = scalar_lea.vmem %s23_s13, 256  ;;  %p139_p1 = scmp.lt.s32.totalorder %s23_s13, %s23_s13 }
   0x6   :  { %p135_p0 = scmp.ne.s32.totalorder %s23_s13, %s134_s14  ;;  %p140_p2 = scmp.lt.s32.totalorder %s134_s14, %s134_s14 }
   0x8   :  { %p141_p3 = por %p140_p2, %p139_p1 }
   0xa   :  { %p142_p4 = pnand %p141_p3, %p135_p0 }
   0xc   :  { %145 = shalt.err (!%p142_p4)
}
   0xd   :  { %s215_s15 = smov 128   ;;  %s216_s16 = smov 8  }
   0xe   :  { %28 = dma.hbm_to_vmem [thread:$0]  %s252_s0, 256, %s23_s13, [#allocation3], %s215_s15, %s215_s15, %s216_s16  }
   0xf   :  { %s217_s19 = smov [#allocation5]  }
  0x10   :  { %s38_s20 = sshll.u32 %s217_s19, 4  ;;  %s39_s20 = int_to_ptr.vmem [resolvable:$true] %s38_s20 }
  0x11   :  { %s154_s21 = scalar_lea.vmem %s39_s20, 256  ;;  %p159_p6 = scmp.lt.s32.totalorder %s39_s20, %s39_s20 }
  0x12   :  { %p155_p5 = scmp.ne.s32.totalorder %s39_s20, %s154_s21  ;;  %p160_p7 = scmp.lt.s32.totalorder %s154_s21, %s154_s21 }
  0x14   :  { %p161_p8 = por %p160_p7, %p159_p6 }
  0x16   :  { %p162_p9 = pnand %p161_p8, %p155_p5 }
  0x18   :  { %165 = shalt.err (!%p162_p9)
}
  0x19   :  { %44 = dma.hbm_to_vmem [thread:$0]  %s253_s1, 256, %s39_s20, [#allocation6], %s215_s15, %s215_s15, %s216_s16  }
  0x1a   :  { %206 = dma.done.wait [#allocation3], 256  }
  0x1b   :  { %207 = vsyncadd [#allocation3], 4294967040 }
  0x1c   :  { %208 = dma.done.wait [#allocation6], 256  }
  0x1d   :  { %209 = vsyncadd [#allocation6], 4294967040  ;;  %v61_v0 = vld [vmem:[#allocation2] sm:$0xff]  ;;  %v62_v1 = vld [vmem:[#allocation2 + $0x8] sm:$0xff]  ;;  %s218_s0 = smov [#allocation7]   ;;  %s219_s24 = smov [#allocation8]  }
  0x1e   :  { %v65_v2 = vmul.f32 0.5, %v61_v0  ;;  %v66_v3 = vmul.f32 0.5, %v62_v1  ;;  %v63_v7 = vld [vmem:[#allocation5] sm:$0xff]  ;;  %v64_v9 = vld [vmem:[#allocation5 + $0x8] sm:$0xff]  ;;  %s91_s1 = sshll.u32 %s218_s0, 4  ;;  %s101_s25 = sshll.u32 %s219_s24, 4  ;;  %s92_s1 = int_to_ptr.vmem [resolvable:$true] %s91_s1  ;;  %s102_s25 = int_to_ptr.vmem [resolvable:$true] %s101_s25 }
  0x1f   :  { %s166_s26 = scalar_lea.vmem %s92_s1, 128  ;;  %p171_p11 = scmp.lt.s32.totalorder %s92_s1, %s92_s1 }
  0x20   :  { %122 = vtanh.f32 %v65_v2  ;;  %p167_p10 = scmp.ne.s32.totalorder %s92_s1, %s166_s26  ;;  %p172_p12 = scmp.lt.s32.totalorder %s166_s26, %s166_s26 }
  0x21   :  { %124 = vtanh.f32 %v66_v3 }
  0x22   :  { %p173_p13 = por %p172_p12, %p171_p11 }
  0x24   :  { %p174_p0 = pnand %p173_p13, %p167_p10 }
  0x2d   :  { %v123_v4 = vpop.eup %122 }
  0x2e   :  { %v125_v5 = vpop.eup %124  ;;  %v69_v6 = vadd.f32 1.0, %v123_v4 }
  0x2f   :  { %v70_v8 = vadd.f32 1.0, %v125_v5 }
  0x30   :  { %v71_v10 = vmul.f32 0.5, %v69_v6 }
  0x31   :  { %v72_v11 = vmul.f32 0.5, %v70_v8 }
  0x32   :  { %v73_v12 = vmul.f32 %v71_v10, %v63_v7  ;;  %v75_v13 = vadd.f32 %v71_v10, %v63_v7 }
  0x33   :  { %v74_v14 = vmul.f32 %v72_v11, %v64_v9  ;;  %v76_v15 = vadd.f32 %v72_v11, %v64_v9 }
  0x35   :  { %v78_v16 = vadd.f32 %v74_v14, %v73_v12  ;;  %v82_v17 = vadd.f32 %v76_v15, %v75_v13 }
  0x37   :  { %80 = vst [vmem:[#allocation7] sm:$0xff] %v78_v16  ;;  %84 = vst [vmem:[#allocation8] sm:$0xff] %v82_v17 }
  0x38   :  { %177 = shalt.err (!%p174_p0)
}
  0x39   :  { %94 = dma.vmem_to_hbm [thread:$0]  %s92_s1, 128, %s254_s2, [#allocation4]  }
  0x3a   :  { %s186_s29 = scalar_lea.vmem %s102_s25, 128  ;;  %p191_p2 = scmp.lt.s32.totalorder %s102_s25, %s102_s25 }
  0x3b   :  { %p187_p1 = scmp.ne.s32.totalorder %s102_s25, %s186_s29  ;;  %p192_p3 = scmp.lt.s32.totalorder %s186_s29, %s186_s29 }
  0x3d   :  { %p193_p4 = por %p192_p3, %p191_p2 }
  0x3f   :  { %p194_p5 = pnand %p193_p4, %p187_p1 }
  0x41   :  { %197 = shalt.err (!%p194_p5)
}
  0x42   :  { %104 = dma.vmem_to_hbm [thread:$0]  %s102_s25, 128, %s255_s3, [#allocation9]  }
  0x43   :  { %210 = dma.done.wait [#allocation4], 128  }
  0x44   :  { %211 = vsyncadd [#allocation4], 4294967168 }
  0x45   :  { %212 = dma.done.wait [#allocation9], 128  }
  0x46   :  { %213 = vsyncadd [#allocation9], 4294967168 }
  0x47   :  { %111 = vsyncpa [#allocation3], 1 }
  0x48   :  { %112 = vsyncpa [#allocation6], 1 }
  0x49   :  { %113 = vsyncpa [#allocation4], 1 }
  0x4a   :  { %114 = vsyncpa [#allocation9], 1 }

</bundles_post_ra>
